<compile_context>
chip_gen: v7x
topology: tpu7x:2x2x1
jax: 0.10.0
libtpu: 0.0.40
codegen_flags: <defaults>
</compile_context>

<pallas_src>
import functools

import jax
import jax.numpy as jnp
import numpy as np
from jax import lax
from jax.experimental import pallas as pl
from jax.experimental.pallas import tpu as pltpu


def _conv3x3(img_f32, w_ref, b_ref, Wp, Pp, dot_dtype):
    """3x3 'valid' conv over the flat padded grid as 9 accumulating per-tap matmuls.

    img_f32:  (C, Pp) f32, padded image flattened onto the lane axis.
    w_ref:    (9, Cout, Cin) weights (tap-major), already in dot_dtype.
    Output lane q (interior of the padded grid) gets
        sum_t w_t @ img[:, q + s_t],   s_t = (dy-1)*Wp + (dx-1),  t = dy*3 + dx.
    Lanes that wrap in the circular roll only ever feed border / alignment-pad outputs,
    which the wrapper discards.
    """
    acc = None
    for dy in range(3):
        for dx in range(3):
            t = dy * 3 + dx
            s = (dy - 1) * Wp + (dx - 1)
            shifted = img_f32 if s == 0 else pltpu.roll(img_f32, (-s) % Pp, axis=1)
            part = jnp.dot(w_ref[t], shifted.astype(dot_dtype),
                           preferred_element_type=jnp.float32)
            acc = part if acc is None else acc + part
    return acc + b_ref[...]


def resnet_block_kernel(xpad_ref, w1_ref, b1_ref, w2_ref, b2_ref, pos_ref, o_ref,
                        *, Hp, Wp, slope, dot_dtype):
    Pp = xpad_ref.shape[-1]
    xp = xpad_ref[0]                      # (C, Pp) f32 reflect-padded input, resident
    row = pos_ref[0:1, :]                 # (1, Pp) int32: q // Wp  (-1 on alignment-pad lanes)
    col = pos_ref[1:2, :]                 # (1, Pp) int32: q %  Wp  (-1 on alignment-pad lanes)

    # ---- conv1: 9 per-tap MXU matmuls (bf16 operands, f32 accumulation) + bias + act ----
    y = _conv3x3(xp, w1_ref, b1_ref, Wp, Pp, dot_dtype)
    if slope != 1.0:                      # LeakyReLU(True) => negative_slope == 1.0 => identity
        y = jnp.where(y >= 0, y, slope * y)

    # ---- in-VMEM reflect padding of y1: rebuild the 1-px border ring from the interior
    #      (columns first, then rows, so corners pick up the doubly-reflected value) ----
    y = jnp.where(col == 0,      pltpu.roll(y, Pp - 2, axis=1), y)       # (i, 0)    <- (i, 2)
    y = jnp.where(col == Wp - 1, pltpu.roll(y, 2, axis=1), y)            # (i, Wp-1) <- (i, Wp-3)
    y = jnp.where(row == 0,      pltpu.roll(y, Pp - 2 * Wp, axis=1), y)  # (0, j)    <- (2, j)
    y = jnp.where(row == Hp - 1, pltpu.roll(y, 2 * Wp, axis=1), y)       # (Hp-1, j) <- (Hp-3, j)

    # ---- conv2 + residual over the whole padded grid (border ring is don't-care:
    #      the wrapper slices out the interior) ----
    out = _conv3x3(y, w2_ref, b2_ref, Wp, Pp, dot_dtype)
    o_ref[0] = xp + out                   # interior of xp == original x (skip connection)


def resnet_block_forward(x_nchw, w1, b1, w2, b2, negative_slope=1.0,
                         dot_dtype=jnp.bfloat16):
    """x_nchw: (N,C,H,W) f32. w*: (C,C,3,3) PyTorch OIHW. b*: (C,)."""
    x = x_nchw.astype(jnp.float32)
    N, C, H, W = x.shape
    assert H >= 2 and W >= 2, "ReflectionPad2d(1) needs H, W >= 2"
    assert w1.shape == (C, C, 3, 3) and w2.shape == (C, C, 3, 3)
    Hp, Wp = H + 2, W + 2
    P = Hp * Wp
    Pp = ((P + 127) // 128) * 128         # lane axis rounded up to full 128-lane tiles

    # Reflect-pad the input once (the intermediate is padded in-kernel) and flatten the
    # padded spatial grid onto the lane axis: pure reshapes, no NCHW<->NHWC transposes.
    xpad = jnp.pad(x, ((0, 0), (0, 0), (1, 1), (1, 1)), mode="reflect").reshape(N, C, P)
    xpad = jnp.pad(xpad, ((0, 0), (0, 0), (0, Pp - P)))

    # PyTorch OIHW -> (tap, Cout, Cin), tap t = dy*3 + dx; stored in the MXU dot dtype.
    def pack_w(w):
        return jnp.transpose(w, (2, 3, 0, 1)).reshape(9, C, C).astype(dot_dtype)

    w1p, w2p = pack_w(w1), pack_w(w2)
    b1p = b1.reshape(C, 1).astype(jnp.float32)
    b2p = b2.reshape(C, 1).astype(jnp.float32)

    # (row, col) of every flat padded-grid lane; -1 on alignment-pad lanes so they never
    # match a border mask.  Precomputed host-side (avoids vector int div/mod in-kernel).
    q = np.arange(Pp, dtype=np.int32)
    pos = jnp.asarray(np.stack([np.where(q < P, q // Wp, -1),
                                np.where(q < P, q % Wp, -1)], axis=0).astype(np.int32))

    # Explicit VMEM budget (re-derived from the actual block sizes; headroom for the
    # in-kernel temporaries; capped below v7x's 64 MiB physical VMEM).
    itemsz = int(np.dtype(dot_dtype).itemsize)
    est = (4 * C * Pp * 4                       # double-buffered (1,C,Pp) f32 in + out blocks
           + 4 * 9 * C * C * itemsz             # two weight packs, double-buffered
           + 4 * C * 4 + 2 * 2 * Pp * 4         # biases + pos, double-buffered
           + 8 * C * Pp * 4)                    # live temporaries (y, acc, rolled/cast copies)
    vmem_limit = int(min(max(2 * est, 32 << 20), 60 << 20))

    out_flat = pl.pallas_call(
        functools.partial(resnet_block_kernel, Hp=Hp, Wp=Wp,
                          slope=float(negative_slope), dot_dtype=dot_dtype),
        out_shape=jax.ShapeDtypeStruct((N, C, Pp), jnp.float32),
        grid=(N,),
        in_specs=[
            pl.BlockSpec((1, C, Pp), lambda n: (n, 0, 0)),   # padded input (lane-dense)
            pl.BlockSpec((9, C, C), lambda n: (0, 0, 0)),    # conv1 weights (tap, Cout, Cin)
            pl.BlockSpec((C, 1), lambda n: (0, 0)),          # conv1 bias (f32)
            pl.BlockSpec((9, C, C), lambda n: (0, 0, 0)),    # conv2 weights
            pl.BlockSpec((C, 1), lambda n: (0, 0)),          # conv2 bias (f32)
            pl.BlockSpec((2, Pp), lambda n: (0, 0)),         # (row, col) lane indices
        ],
        out_specs=pl.BlockSpec((1, C, Pp), lambda n: (n, 0, 0)),
        compiler_params=pltpu.CompilerParams(
            dimension_semantics=("parallel",),               # megacore split across batch
            vmem_limit_bytes=vmem_limit),
    )(xpad, w1p, b1p, w2p, b2p, pos)

    # Drop alignment pad + the 1-px border ring (cheap XLA slice) -> NCHW.
    return out_flat[:, :, :P].reshape(N, C, Hp, Wp)[:, :, 1:H + 1, 1:W + 1]


def _reference_forward(x_nchw, w1, b1, w2, b2, negative_slope=1.0):
    """Pure-JAX reference matching the PyTorch forward (NCHW)."""
    dn = ("NCHW", "OIHW", "NCHW")

    def conv(x, w, b):
        xp = jnp.pad(x, ((0, 0), (0, 0), (1, 1), (1, 1)), mode="reflect")
        y = lax.conv_general_dilated(xp, w, (1, 1), "VALID", dimension_numbers=dn)
        return y + b.reshape(1, -1, 1, 1)

    y = conv(x_nchw, w1, b1)
    y = jnp.where(y >= 0, y, negative_slope * y)   # LeakyReLU(negative_slope=True == 1.0)
    y = conv(y, w2, b2)
    return x_nchw + y


if __name__ == "__main__":
    N, C, H, W = 2, 4, 16, 16                      # dim = 4
    key = jax.random.PRNGKey(0)
    kx, kw1, kb1, kw2, kb2 = jax.random.split(key, 5)

    x = jax.random.normal(kx, (N, C, H, W), dtype=jnp.float32)
    w1 = 0.1 * jax.random.normal(kw1, (C, C, 3, 3), dtype=jnp.float32)
    b1 = 0.1 * jax.random.normal(kb1, (C,), dtype=jnp.float32)
    w2 = 0.1 * jax.random.normal(kw2, (C, C, 3, 3), dtype=jnp.float32)
    b2 = 0.1 * jax.random.normal(kb2, (C,), dtype=jnp.float32)

    ref = jax.block_until_ready(_reference_forward(x, w1, b1, w2, b2))

    # Exact-fidelity path (f32 MXU inputs): tight tolerance.
    out_f32 = jax.block_until_ready(
        jax.jit(functools.partial(resnet_block_forward, dot_dtype=jnp.float32))(
            x, w1, b1, w2, b2))
    assert out_f32.shape == (N, C, H, W) and out_f32.dtype == jnp.float32
    np.testing.assert_allclose(np.asarray(out_f32), np.asarray(ref), rtol=1e-5, atol=1e-5)

    # Default fast path (bf16 MXU inputs, f32 accumulation): loosened tolerance.
    out_bf16 = jax.block_until_ready(jax.jit(resnet_block_forward)(x, w1, b1, w2, b2))
    assert out_bf16.shape == (N, C, H, W) and out_bf16.dtype == jnp.float32
    np.testing.assert_allclose(np.asarray(out_bf16), np.asarray(ref), rtol=3e-2, atol=3e-2)

    print("KERNEL_OK")
</pallas_src>

<mosaic_0001>
module attributes {stable_mosaic.version = 11 : i64} {
  func.func @resnet_block_kernel(%arg0: i32, %arg1: memref<1x4x384xf32, #tpu.memory_space<vmem>>, %arg2: memref<9x4x4xf32, #tpu.memory_space<vmem>>, %arg3: memref<4x1xf32, #tpu.memory_space<vmem>>, %arg4: memref<9x4x4xf32, #tpu.memory_space<vmem>>, %arg5: memref<4x1xf32, #tpu.memory_space<vmem>>, %arg6: memref<2x384xi32, #tpu.memory_space<vmem>>, %arg7: memref<1x4x384xf32, #tpu.memory_space<vmem>>) attributes {dimension_semantics = [#tpu.dimension_semantics<parallel>], iteration_bounds = array<i64: 2>, scalar_prefetch = 0 : i64, scratch_operands = 0 : i64, tpu.core_type = #tpu.core_type<tc>, window_params = [{transform_indices = @transform_0, window_bounds = array<i64: 1, 4, 384>}, {pipeline_mode = #tpu.pipeline_mode<synchronous>, transform_indices = @transform_1, window_bounds = array<i64: 9, 4, 4>}, {pipeline_mode = #tpu.pipeline_mode<synchronous>, transform_indices = @transform_2, window_bounds = array<i64: 4, 1>}, {pipeline_mode = #tpu.pipeline_mode<synchronous>, transform_indices = @transform_3, window_bounds = array<i64: 9, 4, 4>}, {pipeline_mode = #tpu.pipeline_mode<synchronous>, transform_indices = @transform_4, window_bounds = array<i64: 4, 1>}, {pipeline_mode = #tpu.pipeline_mode<synchronous>, transform_indices = @transform_5, window_bounds = array<i64: 2, 384>}, {transform_indices = @transform_6, window_bounds = array<i64: 1, 4, 384>}]} {
    %c0 = arith.constant 0 : index
    %c0_0 = arith.constant 0 : index
    %c0_1 = arith.constant 0 : index
    %0 = vector.load %arg1[%c0, %c0_0, %c0_1] : memref<1x4x384xf32, #tpu.memory_space<vmem>>, vector<1x4x384xf32>
    %1 = vector.shape_cast %0 : vector<1x4x384xf32> to vector<4x384xf32>
    %c0_2 = arith.constant 0 : index
    %c0_3 = arith.constant 0 : index
    %2 = vector.load %arg6[%c0_2, %c0_3] : memref<2x384xi32, #tpu.memory_space<vmem>>, vector<1x384xi32>
    %c1 = arith.constant 1 : index
    %c0_4 = arith.constant 0 : index
    %3 = vector.load %arg6[%c1, %c0_4] : memref<2x384xi32, #tpu.memory_space<vmem>>, vector<1x384xi32>
    %c19_i32 = arith.constant 19 : i32
    %4 = tpu.dynamic_rotate %1 by %c19_i32 dim 1 : vector<4x384xf32>, i32 -> vector<4x384xf32>
    %c0_5 = arith.constant 0 : index
    %c0_6 = arith.constant 0 : index
    %c0_7 = arith.constant 0 : index
    %5 = vector.load %arg2[%c0_5, %c0_6, %c0_7] : memref<9x4x4xf32, #tpu.memory_space<vmem>>, vector<1x4x4xf32>
    %6 = vector.shape_cast %5 : vector<1x4x4xf32> to vector<4x4xf32>
    %cst = arith.constant dense<0.000000e+00> : vector<4x384xf32>
    %7 = tpu.matmul %6, %4, %cst {dimension_numbers = #tpu.dot_dimension_numbers<[1], [0], [0], [1], [0, 0, 1, 1], [], []>} : vector<4x4xf32>, vector<4x384xf32>, vector<4x384xf32> -> vector<4x384xf32>
    %c18_i32 = arith.constant 18 : i32
    %8 = tpu.dynamic_rotate %1 by %c18_i32 dim 1 : vector<4x384xf32>, i32 -> vector<4x384xf32>
    %c1_8 = arith.constant 1 : index
    %c0_9 = arith.constant 0 : index
    %c0_10 = arith.constant 0 : index
    %9 = vector.load %arg2[%c1_8, %c0_9, %c0_10] : memref<9x4x4xf32, #tpu.memory_space<vmem>>, vector<1x4x4xf32>
    %10 = vector.shape_cast %9 : vector<1x4x4xf32> to vector<4x4xf32>
    %cst_11 = arith.constant dense<0.000000e+00> : vector<4x384xf32>
    %11 = tpu.matmul %10, %8, %cst_11 {dimension_numbers = #tpu.dot_dimension_numbers<[1], [0], [0], [1], [0, 0, 1, 1], [], []>} : vector<4x4xf32>, vector<4x384xf32>, vector<4x384xf32> -> vector<4x384xf32>
    %12 = arith.addf %7, %11 : vector<4x384xf32>
    %c17_i32 = arith.constant 17 : i32
    %13 = tpu.dynamic_rotate %1 by %c17_i32 dim 1 : vector<4x384xf32>, i32 -> vector<4x384xf32>
    %c2 = arith.constant 2 : index
    %c0_12 = arith.constant 0 : index
    %c0_13 = arith.constant 0 : index
    %14 = vector.load %arg2[%c2, %c0_12, %c0_13] : memref<9x4x4xf32, #tpu.memory_space<vmem>>, vector<1x4x4xf32>
    %15 = vector.shape_cast %14 : vector<1x4x4xf32> to vector<4x4xf32>
    %cst_14 = arith.constant dense<0.000000e+00> : vector<4x384xf32>
    %16 = tpu.matmul %15, %13, %cst_14 {dimension_numbers = #tpu.dot_dimension_numbers<[1], [0], [0], [1], [0, 0, 1, 1], [], []>} : vector<4x4xf32>, vector<4x384xf32>, vector<4x384xf32> -> vector<4x384xf32>
    %17 = arith.addf %12, %16 : vector<4x384xf32>
    %c1_i32 = arith.constant 1 : i32
    %18 = tpu.dynamic_rotate %1 by %c1_i32 dim 1 : vector<4x384xf32>, i32 -> vector<4x384xf32>
    %c3 = arith.constant 3 : index
    %c0_15 = arith.constant 0 : index
    %c0_16 = arith.constant 0 : index
    %19 = vector.load %arg2[%c3, %c0_15, %c0_16] : memref<9x4x4xf32, #tpu.memory_space<vmem>>, vector<1x4x4xf32>
    %20 = vector.shape_cast %19 : vector<1x4x4xf32> to vector<4x4xf32>
    %cst_17 = arith.constant dense<0.000000e+00> : vector<4x384xf32>
    %21 = tpu.matmul %20, %18, %cst_17 {dimension_numbers = #tpu.dot_dimension_numbers<[1], [0], [0], [1], [0, 0, 1, 1], [], []>} : vector<4x4xf32>, vector<4x384xf32>, vector<4x384xf32> -> vector<4x384xf32>
    %22 = arith.addf %17, %21 : vector<4x384xf32>
    %c4 = arith.constant 4 : index
    %c0_18 = arith.constant 0 : index
    %c0_19 = arith.constant 0 : index
    %23 = vector.load %arg2[%c4, %c0_18, %c0_19] : memref<9x4x4xf32, #tpu.memory_space<vmem>>, vector<1x4x4xf32>
    %24 = vector.shape_cast %23 : vector<1x4x4xf32> to vector<4x4xf32>
    %cst_20 = arith.constant dense<0.000000e+00> : vector<4x384xf32>
    %25 = tpu.matmul %24, %1, %cst_20 {dimension_numbers = #tpu.dot_dimension_numbers<[1], [0], [0], [1], [0, 0, 1, 1], [], []>} : vector<4x4xf32>, vector<4x384xf32>, vector<4x384xf32> -> vector<4x384xf32>
    %26 = arith.addf %22, %25 : vector<4x384xf32>
    %c383_i32 = arith.constant 383 : i32
    %27 = tpu.dynamic_rotate %1 by %c383_i32 dim 1 : vector<4x384xf32>, i32 -> vector<4x384xf32>
    %c5 = arith.constant 5 : index
    %c0_21 = arith.constant 0 : index
    %c0_22 = arith.constant 0 : index
    %28 = vector.load %arg2[%c5, %c0_21, %c0_22] : memref<9x4x4xf32, #tpu.memory_space<vmem>>, vector<1x4x4xf32>
    %29 = vector.shape_cast %28 : vector<1x4x4xf32> to vector<4x4xf32>
    %cst_23 = arith.constant dense<0.000000e+00> : vector<4x384xf32>
    %30 = tpu.matmul %29, %27, %cst_23 {dimension_numbers = #tpu.dot_dimension_numbers<[1], [0], [0], [1], [0, 0, 1, 1], [], []>} : vector<4x4xf32>, vector<4x384xf32>, vector<4x384xf32> -> vector<4x384xf32>
    %31 = arith.addf %26, %30 : vector<4x384xf32>
    %c367_i32 = arith.constant 367 : i32
    %32 = tpu.dynamic_rotate %1 by %c367_i32 dim 1 : vector<4x384xf32>, i32 -> vector<4x384xf32>
    %c6 = arith.constant 6 : index
    %c0_24 = arith.constant 0 : index
    %c0_25 = arith.constant 0 : index
    %33 = vector.load %arg2[%c6, %c0_24, %c0_25] : memref<9x4x4xf32, #tpu.memory_space<vmem>>, vector<1x4x4xf32>
    %34 = vector.shape_cast %33 : vector<1x4x4xf32> to vector<4x4xf32>
    %cst_26 = arith.constant dense<0.000000e+00> : vector<4x384xf32>
    %35 = tpu.matmul %34, %32, %cst_26 {dimension_numbers = #tpu.dot_dimension_numbers<[1], [0], [0], [1], [0, 0, 1, 1], [], []>} : vector<4x4xf32>, vector<4x384xf32>, vector<4x384xf32> -> vector<4x384xf32>
    %36 = arith.addf %31, %35 : vector<4x384xf32>
    %c366_i32 = arith.constant 366 : i32
    %37 = tpu.dynamic_rotate %1 by %c366_i32 dim 1 : vector<4x384xf32>, i32 -> vector<4x384xf32>
    %c7 = arith.constant 7 : index
    %c0_27 = arith.constant 0 : index
    %c0_28 = arith.constant 0 : index
    %38 = vector.load %arg2[%c7, %c0_27, %c0_28] : memref<9x4x4xf32, #tpu.memory_space<vmem>>, vector<1x4x4xf32>
    %39 = vector.shape_cast %38 : vector<1x4x4xf32> to vector<4x4xf32>
    %cst_29 = arith.constant dense<0.000000e+00> : vector<4x384xf32>
    %40 = tpu.matmul %39, %37, %cst_29 {dimension_numbers = #tpu.dot_dimension_numbers<[1], [0], [0], [1], [0, 0, 1, 1], [], []>} : vector<4x4xf32>, vector<4x384xf32>, vector<4x384xf32> -> vector<4x384xf32>
    %41 = arith.addf %36, %40 : vector<4x384xf32>
    %c365_i32 = arith.constant 365 : i32
    %42 = tpu.dynamic_rotate %1 by %c365_i32 dim 1 : vector<4x384xf32>, i32 -> vector<4x384xf32>
    %c8 = arith.constant 8 : index
    %c0_30 = arith.constant 0 : index
    %c0_31 = arith.constant 0 : index
    %43 = vector.load %arg2[%c8, %c0_30, %c0_31] : memref<9x4x4xf32, #tpu.memory_space<vmem>>, vector<1x4x4xf32>
    %44 = vector.shape_cast %43 : vector<1x4x4xf32> to vector<4x4xf32>
    %cst_32 = arith.constant dense<0.000000e+00> : vector<4x384xf32>
    %45 = tpu.matmul %44, %42, %cst_32 {dimension_numbers = #tpu.dot_dimension_numbers<[1], [0], [0], [1], [0, 0, 1, 1], [], []>} : vector<4x4xf32>, vector<4x384xf32>, vector<4x384xf32> -> vector<4x384xf32>
    %46 = arith.addf %41, %45 : vector<4x384xf32>
    %c0_33 = arith.constant 0 : index
    %c0_34 = arith.constant 0 : index
    %47 = vector.load %arg3[%c0_33, %c0_34] : memref<4x1xf32, #tpu.memory_space<vmem>>, vector<4x1xf32>
    %48 = vector.broadcast %47 : vector<4x1xf32> to vector<4x384xf32>
    %49 = arith.addf %46, %48 : vector<4x384xf32>
    %c0_i32 = arith.constant 0 : i32
    %50 = vector.broadcast %c0_i32 : i32 to vector<1x384xi32>
    %51 = arith.cmpi eq, %3, %50 : vector<1x384xi32>
    %c382_i32 = arith.constant 382 : i32
    %52 = tpu.dynamic_rotate %49 by %c382_i32 dim 1 : vector<4x384xf32>, i32 -> vector<4x384xf32>
    %53 = vector.shape_cast %51 : vector<1x384xi1> to vector<1x384xi1>
    %54 = vector.broadcast %53 : vector<1x384xi1> to vector<4x384xi1>
    %55 = arith.select %54, %52, %49 : vector<4x384xi1>, vector<4x384xf32>
    %c17_i32_35 = arith.constant 17 : i32
    %56 = vector.broadcast %c17_i32_35 : i32 to vector<1x384xi32>
    %57 = arith.cmpi eq, %3, %56 : vector<1x384xi32>
    %c2_i32 = arith.constant 2 : i32
    %58 = tpu.dynamic_rotate %55 by %c2_i32 dim 1 : vector<4x384xf32>, i32 -> vector<4x384xf32>
    %59 = vector.shape_cast %57 : vector<1x384xi1> to vector<1x384xi1>
    %60 = vector.broadcast %59 : vector<1x384xi1> to vector<4x384xi1>
    %61 = arith.select %60, %58, %55 : vector<4x384xi1>, vector<4x384xf32>
    %c0_i32_36 = arith.constant 0 : i32
    %62 = vector.broadcast %c0_i32_36 : i32 to vector<1x384xi32>
    %63 = arith.cmpi eq, %2, %62 : vector<1x384xi32>
    %c348_i32 = arith.constant 348 : i32
    %64 = tpu.dynamic_rotate %61 by %c348_i32 dim 1 : vector<4x384xf32>, i32 -> vector<4x384xf32>
    %65 = vector.shape_cast %63 : vector<1x384xi1> to vector<1x384xi1>
    %66 = vector.broadcast %65 : vector<1x384xi1> to vector<4x384xi1>
    %67 = arith.select %66, %64, %61 : vector<4x384xi1>, vector<4x384xf32>
    %c17_i32_37 = arith.constant 17 : i32
    %68 = vector.broadcast %c17_i32_37 : i32 to vector<1x384xi32>
    %69 = arith.cmpi eq, %2, %68 : vector<1x384xi32>
    %c36_i32 = arith.constant 36 : i32
    %70 = tpu.dynamic_rotate %67 by %c36_i32 dim 1 : vector<4x384xf32>, i32 -> vector<4x384xf32>
    %71 = vector.shape_cast %69 : vector<1x384xi1> to vector<1x384xi1>
    %72 = vector.broadcast %71 : vector<1x384xi1> to vector<4x384xi1>
    %73 = arith.select %72, %70, %67 : vector<4x384xi1>, vector<4x384xf32>
    %c19_i32_38 = arith.constant 19 : i32
    %74 = tpu.dynamic_rotate %73 by %c19_i32_38 dim 1 : vector<4x384xf32>, i32 -> vector<4x384xf32>
    %c0_39 = arith.constant 0 : index
    %c0_40 = arith.constant 0 : index
    %c0_41 = arith.constant 0 : index
    %75 = vector.load %arg4[%c0_39, %c0_40, %c0_41] : memref<9x4x4xf32, #tpu.memory_space<vmem>>, vector<1x4x4xf32>
    %76 = vector.shape_cast %75 : vector<1x4x4xf32> to vector<4x4xf32>
    %cst_42 = arith.constant dense<0.000000e+00> : vector<4x384xf32>
    %77 = tpu.matmul %76, %74, %cst_42 {dimension_numbers = #tpu.dot_dimension_numbers<[1], [0], [0], [1], [0, 0, 1, 1], [], []>} : vector<4x4xf32>, vector<4x384xf32>, vector<4x384xf32> -> vector<4x384xf32>
    %c18_i32_43 = arith.constant 18 : i32
    %78 = tpu.dynamic_rotate %73 by %c18_i32_43 dim 1 : vector<4x384xf32>, i32 -> vector<4x384xf32>
    %c1_44 = arith.constant 1 : index
    %c0_45 = arith.constant 0 : index
    %c0_46 = arith.constant 0 : index
    %79 = vector.load %arg4[%c1_44, %c0_45, %c0_46] : memref<9x4x4xf32, #tpu.memory_space<vmem>>, vector<1x4x4xf32>
    %80 = vector.shape_cast %79 : vector<1x4x4xf32> to vector<4x4xf32>
    %cst_47 = arith.constant dense<0.000000e+00> : vector<4x384xf32>
    %81 = tpu.matmul %80, %78, %cst_47 {dimension_numbers = #tpu.dot_dimension_numbers<[1], [0], [0], [1], [0, 0, 1, 1], [], []>} : vector<4x4xf32>, vector<4x384xf32>, vector<4x384xf32> -> vector<4x384xf32>
    %82 = arith.addf %77, %81 : vector<4x384xf32>
    %c17_i32_48 = arith.constant 17 : i32
    %83 = tpu.dynamic_rotate %73 by %c17_i32_48 dim 1 : vector<4x384xf32>, i32 -> vector<4x384xf32>
    %c2_49 = arith.constant 2 : index
    %c0_50 = arith.constant 0 : index
    %c0_51 = arith.constant 0 : index
    %84 = vector.load %arg4[%c2_49, %c0_50, %c0_51] : memref<9x4x4xf32, #tpu.memory_space<vmem>>, vector<1x4x4xf32>
    %85 = vector.shape_cast %84 : vector<1x4x4xf32> to vector<4x4xf32>
    %cst_52 = arith.constant dense<0.000000e+00> : vector<4x384xf32>
    %86 = tpu.matmul %85, %83, %cst_52 {dimension_numbers = #tpu.dot_dimension_numbers<[1], [0], [0], [1], [0, 0, 1, 1], [], []>} : vector<4x4xf32>, vector<4x384xf32>, vector<4x384xf32> -> vector<4x384xf32>
    %87 = arith.addf %82, %86 : vector<4x384xf32>
    %c1_i32_53 = arith.constant 1 : i32
    %88 = tpu.dynamic_rotate %73 by %c1_i32_53 dim 1 : vector<4x384xf32>, i32 -> vector<4x384xf32>
    %c3_54 = arith.constant 3 : index
    %c0_55 = arith.constant 0 : index
    %c0_56 = arith.constant 0 : index
    %89 = vector.load %arg4[%c3_54, %c0_55, %c0_56] : memref<9x4x4xf32, #tpu.memory_space<vmem>>, vector<1x4x4xf32>
    %90 = vector.shape_cast %89 : vector<1x4x4xf32> to vector<4x4xf32>
    %cst_57 = arith.constant dense<0.000000e+00> : vector<4x384xf32>
    %91 = tpu.matmul %90, %88, %cst_57 {dimension_numbers = #tpu.dot_dimension_numbers<[1], [0], [0], [1], [0, 0, 1, 1], [], []>} : vector<4x4xf32>, vector<4x384xf32>, vector<4x384xf32> -> vector<4x384xf32>
    %92 = arith.addf %87, %91 : vector<4x384xf32>
    %c4_58 = arith.constant 4 : index
    %c0_59 = arith.constant 0 : index
    %c0_60 = arith.constant 0 : index
    %93 = vector.load %arg4[%c4_58, %c0_59, %c0_60] : memref<9x4x4xf32, #tpu.memory_space<vmem>>, vector<1x4x4xf32>
    %94 = vector.shape_cast %93 : vector<1x4x4xf32> to vector<4x4xf32>
    %cst_61 = arith.constant dense<0.000000e+00> : vector<4x384xf32>
    %95 = tpu.matmul %94, %73, %cst_61 {dimension_numbers = #tpu.dot_dimension_numbers<[1], [0], [0], [1], [0, 0, 1, 1], [], []>} : vector<4x4xf32>, vector<4x384xf32>, vector<4x384xf32> -> vector<4x384xf32>
    %96 = arith.addf %92, %95 : vector<4x384xf32>
    %c383_i32_62 = arith.constant 383 : i32
    %97 = tpu.dynamic_rotate %73 by %c383_i32_62 dim 1 : vector<4x384xf32>, i32 -> vector<4x384xf32>
    %c5_63 = arith.constant 5 : index
    %c0_64 = arith.constant 0 : index
    %c0_65 = arith.constant 0 : index
    %98 = vector.load %arg4[%c5_63, %c0_64, %c0_65] : memref<9x4x4xf32, #tpu.memory_space<vmem>>, vector<1x4x4xf32>
    %99 = vector.shape_cast %98 : vector<1x4x4xf32> to vector<4x4xf32>
    %cst_66 = arith.constant dense<0.000000e+00> : vector<4x384xf32>
    %100 = tpu.matmul %99, %97, %cst_66 {dimension_numbers = #tpu.dot_dimension_numbers<[1], [0], [0], [1], [0, 0, 1, 1], [], []>} : vector<4x4xf32>, vector<4x384xf32>, vector<4x384xf32> -> vector<4x384xf32>
    %101 = arith.addf %96, %100 : vector<4x384xf32>
    %c367_i32_67 = arith.constant 367 : i32
    %102 = tpu.dynamic_rotate %73 by %c367_i32_67 dim 1 : vector<4x384xf32>, i32 -> vector<4x384xf32>
    %c6_68 = arith.constant 6 : index
    %c0_69 = arith.constant 0 : index
    %c0_70 = arith.constant 0 : index
    %103 = vector.load %arg4[%c6_68, %c0_69, %c0_70] : memref<9x4x4xf32, #tpu.memory_space<vmem>>, vector<1x4x4xf32>
    %104 = vector.shape_cast %103 : vector<1x4x4xf32> to vector<4x4xf32>
    %cst_71 = arith.constant dense<0.000000e+00> : vector<4x384xf32>
    %105 = tpu.matmul %104, %102, %cst_71 {dimension_numbers = #tpu.dot_dimension_numbers<[1], [0], [0], [1], [0, 0, 1, 1], [], []>} : vector<4x4xf32>, vector<4x384xf32>, vector<4x384xf32> -> vector<4x384xf32>
    %106 = arith.addf %101, %105 : vector<4x384xf32>
    %c366_i32_72 = arith.constant 366 : i32
    %107 = tpu.dynamic_rotate %73 by %c366_i32_72 dim 1 : vector<4x384xf32>, i32 -> vector<4x384xf32>
    %c7_73 = arith.constant 7 : index
    %c0_74 = arith.constant 0 : index
    %c0_75 = arith.constant 0 : index
    %108 = vector.load %arg4[%c7_73, %c0_74, %c0_75] : memref<9x4x4xf32, #tpu.memory_space<vmem>>, vector<1x4x4xf32>
    %109 = vector.shape_cast %108 : vector<1x4x4xf32> to vector<4x4xf32>
    %cst_76 = arith.constant dense<0.000000e+00> : vector<4x384xf32>
    %110 = tpu.matmul %109, %107, %cst_76 {dimension_numbers = #tpu.dot_dimension_numbers<[1], [0], [0], [1], [0, 0, 1, 1], [], []>} : vector<4x4xf32>, vector<4x384xf32>, vector<4x384xf32> -> vector<4x384xf32>
    %111 = arith.addf %106, %110 : vector<4x384xf32>
    %c365_i32_77 = arith.constant 365 : i32
    %112 = tpu.dynamic_rotate %73 by %c365_i32_77 dim 1 : vector<4x384xf32>, i32 -> vector<4x384xf32>
    %c8_78 = arith.constant 8 : index
    %c0_79 = arith.constant 0 : index
    %c0_80 = arith.constant 0 : index
    %113 = vector.load %arg4[%c8_78, %c0_79, %c0_80] : memref<9x4x4xf32, #tpu.memory_space<vmem>>, vector<1x4x4xf32>
    %114 = vector.shape_cast %113 : vector<1x4x4xf32> to vector<4x4xf32>
    %cst_81 = arith.constant dense<0.000000e+00> : vector<4x384xf32>
    %115 = tpu.matmul %114, %112, %cst_81 {dimension_numbers = #tpu.dot_dimension_numbers<[1], [0], [0], [1], [0, 0, 1, 1], [], []>} : vector<4x4xf32>, vector<4x384xf32>, vector<4x384xf32> -> vector<4x384xf32>
    %116 = arith.addf %111, %115 : vector<4x384xf32>
    %c0_82 = arith.constant 0 : index
    %c0_83 = arith.constant 0 : index
    %117 = vector.load %arg5[%c0_82, %c0_83] : memref<4x1xf32, #tpu.memory_space<vmem>>, vector<4x1xf32>
    %118 = vector.broadcast %117 : vector<4x1xf32> to vector<4x384xf32>
    %119 = arith.addf %116, %118 : vector<4x384xf32>
    %120 = arith.addf %1, %119 : vector<4x384xf32>
    %c0_84 = arith.constant 0 : index
    %c0_85 = arith.constant 0 : index
    %c0_86 = arith.constant 0 : index
    %121 = vector.load %arg7[%c0_84, %c0_85, %c0_86] : memref<1x4x384xf32, #tpu.memory_space<vmem>>, vector<1x4x384xf32>
    %122 = vector.shape_cast %121 : vector<1x4x384xf32> to vector<4x384xf32>
    %123 = vector.shape_cast %120 : vector<4x384xf32> to vector<1x4x384xf32>
    tpu.vector_store %arg7[%c0_84, %c0_85, %c0_86], %123 {strides = array<i32>} : memref<1x4x384xf32, #tpu.memory_space<vmem>>, vector<1x4x384xf32>,
    return
  }
  func.func @transform_0(%arg0: i32) -> (i32, i32, i32) {
    %c0_i32 = arith.constant 0 : i32
    %c0_i32_0 = arith.constant 0 : i32
    %c0_i32_1 = arith.constant 0 : i32
    return %arg0, %c0_i32, %c0_i32_0 : i32, i32, i32
  }
  func.func @transform_1(%arg0: i32) -> (i32, i32, i32) {
    %c0_i32 = arith.constant 0 : i32
    %c0_i32_0 = arith.constant 0 : i32
    %c0_i32_1 = arith.constant 0 : i32
    %c0_i32_2 = arith.constant 0 : i32
    return %c0_i32, %c0_i32_0, %c0_i32_1 : i32, i32, i32
  }
  func.func @transform_2(%arg0: i32) -> (i32, i32) {
    %c0_i32 = arith.constant 0 : i32
    %c0_i32_0 = arith.constant 0 : i32
    %c0_i32_1 = arith.constant 0 : i32
    return %c0_i32, %c0_i32_0 : i32, i32
  }
  func.func @transform_3(%arg0: i32) -> (i32, i32, i32) {
    %c0_i32 = arith.constant 0 : i32
    %c0_i32_0 = arith.constant 0 : i32
    %c0_i32_1 = arith.constant 0 : i32
    %c0_i32_2 = arith.constant 0 : i32
    return %c0_i32, %c0_i32_0, %c0_i32_1 : i32, i32, i32
  }
  func.func @transform_4(%arg0: i32) -> (i32, i32) {
    %c0_i32 = arith.constant 0 : i32
    %c0_i32_0 = arith.constant 0 : i32
    %c0_i32_1 = arith.constant 0 : i32
    return %c0_i32, %c0_i32_0 : i32, i32
  }
  func.func @transform_5(%arg0: i32) -> (i32, i32) {
    %c0_i32 = arith.constant 0 : i32
    %c0_i32_0 = arith.constant 0 : i32
    %c0_i32_1 = arith.constant 0 : i32
    return %c0_i32, %c0_i32_0 : i32, i32
  }
  func.func @transform_6(%arg0: i32) -> (i32, i32, i32) {
    %c0_i32 = arith.constant 0 : i32
    %c0_i32_0 = arith.constant 0 : i32
    %c0_i32_1 = arith.constant 0 : i32
    return %arg0, %c0_i32, %c0_i32_0 : i32, i32, i32
  }
}

</mosaic_0001>

<bundles_post_ra>
// kernel: resnet_block_forward.1
= control target key start
LH: loop header
LB: loop body
LE: loop exit
PB: predicated region body
PF: predicated region fallthrough
CT: control target
= control target key end

     0   :  { %s3803_s21 = smov 0   ;;  %s4308_s0 = inlined_call_operand.vmem [shape: f32[2,4,384], index: 0, kind: input, shape index: {}]   ;;  %s4309_s1 = inlined_call_operand.vmem [shape: f32[9,4,4], index: 1, kind: input, shape index: {}]   ;;  %s4310_s2 = inlined_call_operand.vmem [shape: f32[4,1], index: 2, kind: input, shape index: {}]   ;;  %s4311_s3 = inlined_call_operand.vmem [shape: f32[9,4,4], index: 3, kind: input, shape index: {}]   ;;  %s4312_s4 = inlined_call_operand.vmem [shape: f32[4,1], index: 4, kind: input, shape index: {}]   ;;  %s4313_s5 = inlined_call_operand.vmem [shape: s32[2,384], index: 5, kind: input, shape index: {}]   ;;  %s4314_s6 = inlined_call_operand.vmem [shape: f32[2,4,384], index: 6, kind: output, shape index: {}]  }
   0x1 LB: > { %s3445_s22 = sadd.s32 4294967295, %s3751_s21   ;;  %p3449_p0 = scmp.ge.s32.totalorder %s3751_s21, 1  ;;  %s3751_s21 = sphi %s3803_s21, %s16_s21  }
   0x2   : > { %p212_p1 = scmp.lt.s32.totalorder %s3751_s21, 3 }
   0x4   : > { %p213_p2 = pnand %p3449_p0, %p212_p1 }
   0x5   : > { %p242_p3 = scmp.lt.s32.totalorder (!%p213_p2), %s3445_s22, 1  ;;  %v3753_v0 = vmov (!%p213_p2), 0.0   ;;  %vm3754_vm0 = vmmov (!%p213_p2), 0   ;;  %s3755_s27 = smov (!%p213_p2), 18   ;;  %v1757_v4 = vld [vmem:[%s4310_s2] sm:$0xf] (!%p213_p2)  ;;  %v267_v6 = vlaneseq (!%p213_p2) }
   0x6   : > { %216 = sbr.rel (%p213_p2) target bundleno = 1303 (0x517), region = 44  ;;  %3597 = vmatprep.subr.mxu1 (!%p213_p2), %v3753_v0  ;;  %364 = vmatprep.mubr.f32.mxu0 (!%p213_p2), %v3753_v0  ;;  %s3756_s28 = smov (!%p213_p2), 19   ;;  %v3763_v5 = vmov (!%p213_p2), 0   ;;  %vm290_vm2 = vcmask (!%p213_p2), 1043456   ;;  %v3453_v14 = vld [vmem:[%s4309_s1 + $0x4] sm:$0xf] (!%p213_p2) }
   0x7   : > { %3599 = vmatprep.mubr.msk.f32.mxu1 (!%p213_p2), %vm3754_vm0, %v3753_v0  ;;  %s3757_s29 = smov (!%p213_p2), 17   ;;  %s3758_s30 = smov (!%p213_p2), 1   ;;  %3743 = vset.pattern.permute.xlu0 (!%p213_p2), %v3763_v5  ;;  %v3884_v7 = vand.u32 (!%p213_p2), 127, %v267_v6  ;;  %vm286_vm3 = vcmask (!%p213_p2), 31744   ;;  %v273_v21 = vld [vmem:[%s4309_s1] sm:$0xf] (!%p213_p2) }
   0x8   : > { %s3759_s7 = smov (!%p213_p2), 127   ;;  %s3760_s8 = smov (!%p213_p2), 111   ;;  %v3464_v29 = vld [vmem:[%s4309_s1 + $0x8] sm:$0xf] (!%p213_p2)  ;;  %v3470_v35 = vld [vmem:[%s4309_s1 + $0xc] sm:$0xf] (!%p213_p2) }
   0x9   : > { %s3761_s9 = smov (!%p213_p2), 110   ;;  %s3762_s10 = smov (!%p213_p2), 109   ;;  %vm280_vm1 = vcmp.lt.s32.totalorder (!%p213_p2), %v3884_v7, 18  ;;  %vm269_vm4 = vcmp.lt.s32.totalorder (!%p213_p2), %v3884_v7, 19  ;;  %vm600_vm5 = vcmp.lt.s32.totalorder (!%p213_p2), %v3884_v7, 17  ;;  %vm768_vm6 = vcmp.lt.s32.totalorder (!%p213_p2), %v3884_v7, 1 }
   0xa   : > { %v3476_v38 = vld [vmem:[%s4309_s1 + $0x10] sm:$0xf] (!%p213_p2)  ;;  %vm1091_vm7 = vcmp.lt.s32.totalorder (!%p213_p2), %v3884_v7, 127  ;;  %v3482_v41 = vld [vmem:[%s4309_s1 + $0x14] sm:$0xf] (!%p213_p2)  ;;  %vm1259_vm8 = vcmp.lt.s32.totalorder (!%p213_p2), %v3884_v7, 111 }
   0xb   : > { %v3488_v46 = vld [vmem:[%s4309_s1 + $0x18] sm:$0xf] (!%p213_p2)  ;;  %vm4316_vm9 = vcmp.lt.s32.totalorder (!%p213_p2), %v3884_v7, 110  ;;  %v3494_v54 = vld [vmem:[%s4309_s1 + $0x1c] sm:$0xf] (!%p213_p2)  ;;  %vm4315_vm10 = vcmp.lt.s32.totalorder (!%p213_p2), %v3884_v7, 109 }
   0xc   : > { %v3500_v57 = vld [vmem:[%s4309_s1 + $0x20] sm:$0xf] (!%p213_p2)  ;;  %s3764_s18 = smov (!%p213_p2), 126   ;;  %vm1773_vm14 = vcmp.lt.s32.totalorder (!%p213_p2), %v3884_v7, 126  ;;  %s3765_s24 = smov (!%p213_p2), 2  }
   0xd   : > { %s4324_s22 = smov (!%p242_p3, %s3445_s22), 1  ;;  %s3766_s25 = smov 92  }
   0xe   : > { %s3719_s23 = smul.u32 12, %s4324_s22  ;;  %s3767_s12 = smov 36  }
  0x10   : > { %s246_s26 = scalar_lea.vmem %s4308_s0, %s3719_s23 }
  0x11   : > { %v3823_v1 = vld [vmem:[%s246_s26 + $0x8] sm:$0xf]  ;;  %v3825_v2 = vld [vmem:[%s246_s26] sm:$0xff] }
  0x12   : > { %278 = vrot.lane.b32.xlu1 %v3823_v1, %s3755_s27  ;;  %274 = vrot.lane.b32.xlu0 %v3825_v2, %s3755_s27  ;;  %v3833_v3 = vcombine.high %v3825_v2, %v3825_v2 }
  0x16   : > { %261 = vrot.lane.b32.xlu1 %v3825_v2, %s3756_s28  ;;  %276 = vrot.lane.b32.xlu0 %v3833_v3, %s3755_s27 }
  0x1a   : > { %265 = vrot.lane.b32.xlu1 %v3823_v1, %s3756_s28  ;;  %263 = vrot.lane.b32.xlu0 %v3833_v3, %s3756_s28 }
  0x1e   : > { %594 = vrot.lane.b32.xlu0 %v3825_v2, %s3757_s29  ;;  %596 = vrot.lane.b32.xlu1 %v3833_v3, %s3757_s29 }
  0x22   : > { %598 = vrot.lane.b32.xlu0 %v3823_v1, %s3757_s29  ;;  %762 = vrot.lane.b32.xlu1 %v3825_v2, %s3758_s30 }
  0x26   : > { %764 = vrot.lane.b32.xlu0 %v3833_v3, %s3758_s30  ;;  %766 = vrot.lane.b32.xlu1 %v3823_v1, %s3758_s30 }
  0x2a   : > { %1087 = vrot.lane.b32.xlu0 %v3833_v3, %s3759_s7  ;;  %1089 = vrot.lane.b32.xlu1 %v3823_v1, %s3759_s7 }
  0x2e   : > { %1085 = vrot.lane.b32.xlu0 %v3825_v2, %s3759_s7  ;;  %1255 = vrot.lane.b32.xlu1 %v3833_v3, %s3760_s8 }
  0x32   : > { %1253 = vrot.lane.b32.xlu1 %v3825_v2, %s3760_s8  ;;  %1257 = vrot.lane.b32.xlu0 %v3823_v1, %s3760_s8 }
  0x36   : > { %1425 = vrot.lane.b32.xlu1 %v3823_v1, %s3761_s9  ;;  %1423 = vrot.lane.b32.xlu0 %v3833_v3, %s3761_s9 }
  0x3a   : > { %1589 = vrot.lane.b32.xlu1 %v3825_v2, %s3762_s10  ;;  %1421 = vrot.lane.b32.xlu0 %v3825_v2, %s3761_s9 }
  0x3e   : > { %1593 = vrot.lane.b32.xlu1 %v3823_v1, %s3762_s10  ;;  %1591 = vrot.lane.b32.xlu0 %v3833_v3, %s3762_s10 }
  0x42   : > { %1760 = vperm.xlu0 %3743, %v1757_v4  }
  0x84   : > { %v279_v8 = vpop.permute.xlu1 %278  ;;  %v275_v9 = vpop.permute.xlu0 %274 }
  0x85   : > { %v283_v15 = vsel %vm280_vm1, %v279_v8, %v275_v9 }
  0x88   : > { %v262_v10 = vpop.permute.xlu1 %261  ;;  %v277_v11 = vpop.permute.xlu0 %276 }
  0x89   : > { %v282_v12 = vsel %vm280_vm1, %v275_v9, %v277_v11  ;;  %v281_v13 = vsel %vm280_vm1, %v277_v11, %v279_v8 }
  0x8a   : > { %3454 = vmatprep.subr.msk.mxu0 %vm290_vm2, %v282_v12  ;;  %3598 = vmatpush3.msk.msra.mxu1 %vm290_vm2, %v281_v13 }
  0x8b   : > { %3455 = vmatpush1.msk.msra.mxu0 %vm290_vm2, %v283_v15  ;;  %3602 = vmatprep.subr.mxu1 %v3753_v0 }
  0x8c   : > { %v266_v16 = vpop.permute.xlu1 %265  ;;  %3456 = vmatmul.mubr.msk.f32.vlgmr.msra.gmra.mrb[0].mxu0 %vm286_vm3, %v3453_v14  ;;  %v264_v17 = vpop.permute.xlu0 %263  ;;  %3600 = vmatmul.mubr.msk.f32.vlgmr.msra.gmra.mrb[0].mxu1 %vm286_vm3, %v3453_v14 }
  0x8d   : > { %v272_v18 = vsel %vm269_vm4, %v266_v16, %v262_v10  ;;  %v270_v19 = vsel %vm269_vm4, %v264_v17, %v266_v16  ;;  %v271_v20 = vsel %vm269_vm4, %v262_v10, %v264_v17  ;;  %517 = vmatprep.mubr.f32.mxu0 %v3753_v0  ;;  %3604 = vmatprep.mubr.msk.f32.mxu1 %vm3754_vm0, %v3753_v0 }
  0x8e   : > { %3459 = vmatprep.subr.msk.mxu0 %vm290_vm2, %v271_v20  ;;  %3603 = vmatpush3.msk.msra.mxu1 %vm290_vm2, %v270_v19 }
  0x8f   : > { %3460 = vmatpush1.msk.msra.mxu0 %vm290_vm2, %v272_v18  ;;  %3607 = vmatprep.subr.mxu1 %v3753_v0 }
  0x90   : > { %v595_v22 = vpop.permute.xlu0 %594  ;;  %v597_v23 = vpop.permute.xlu1 %596  ;;  %3605 = vmatmul.mubr.msk.f32.vlgmr.msra.gmra.mrb[2].mxu1 %vm286_vm3, %v273_v21 }
  0x91   : > { %v602_v24 = vsel %vm600_vm5, %v595_v22, %v597_v23  ;;  %3609 = vmatprep.mubr.msk.f32.mxu1 %vm3754_vm0, %v3753_v0 }
  0x92   : > { %3465 = vmatprep.subr.msk.mxu0 %vm290_vm2, %v602_v24 }
  0x94   : > { %3461 = vmatmul.mubr.msk.f32.vlgmr.msra.gmra.mrb[0].mxu0 %vm286_vm3, %v273_v21  ;;  %v599_v25 = vpop.permute.xlu0 %598  ;;  %v763_v26 = vpop.permute.xlu1 %762 }
  0x95   : > { %v601_v27 = vsel %vm600_vm5, %v597_v23, %v599_v25  ;;  %v603_v28 = vsel %vm600_vm5, %v599_v25, %v595_v22  ;;  %682 = vmatprep.mubr.f32.mxu0 %v3753_v0 }
  0x96   : > { %3466 = vmatpush1.msk.msra.mxu0 %vm290_vm2, %v603_v28  ;;  %3608 = vmatpush3.msk.msra.mxu1 %vm290_vm2, %v601_v27 }
  0x97   : > { %3612 = vmatprep.subr.mxu1 %v3753_v0  ;;  %3610 = vmatmul.mubr.msk.f32.vlgmr.msra.gmra.mrb[4].mxu1 %vm286_vm3, %v3464_v29 }
  0x98   : > { %v765_v30 = vpop.permute.xlu0 %764  ;;  %v767_v31 = vpop.permute.xlu1 %766  ;;  %3614 = vmatprep.mubr.msk.f32.mxu1 %vm3754_vm0, %v3753_v0 }
  0x99   : > { %v770_v32 = vsel %vm768_vm6, %v763_v26, %v765_v30  ;;  %v769_v33 = vsel %vm768_vm6, %v765_v30, %v767_v31  ;;  %v771_v34 = vsel %vm768_vm6, %v767_v31, %v763_v26 }
  0x9a   : > { %3471 = vmatprep.subr.msk.mxu0 %vm290_vm2, %v770_v32  ;;  %3613 = vmatpush3.msk.msra.mxu1 %vm290_vm2, %v769_v33 }
  0x9b   : > { %3615 = vmatmul.mubr.msk.f32.vlgmr.msra.gmra.mrb[6].mxu1 %vm286_vm3, %v3470_v35  ;;  %3617 = vmatprep.subr.mxu1 %v3753_v0 }
  0x9c   : > { %3467 = vmatmul.mubr.msk.f32.vlgmr.msra.gmra.mrb[0].mxu0 %vm286_vm3, %v3464_v29  ;;  %v1088_v36 = vpop.permute.xlu0 %1087  ;;  %v1090_v37 = vpop.permute.xlu1 %1089  ;;  %3618 = vmatpush3.msk.msra.mxu1 %vm290_vm2, %v3823_v1 }
  0x9d   : > { %3472 = vmatpush1.msk.msra.mxu0 %vm290_vm2, %v771_v34  ;;  %850 = vmatprep.mubr.f32.mxu0 %v3753_v0  ;;  %v1092_v43 = vsel %vm1091_vm7, %v1088_v36, %v1090_v37 }
  0x9e   : > { %3477 = vmatprep.subr.msk.mxu0 %vm290_vm2, %v3833_v3  ;;  %3619 = vmatprep.mubr.msk.f32.mxu1 %vm3754_vm0, %v3753_v0 }
  0x9f   : > { %3622 = vmatprep.subr.mxu1 %v3753_v0  ;;  %3620 = vmatmul.mubr.msk.f32.vlgmr.msra.gmra.mrb[8].mxu1 %vm286_vm3, %v3476_v38 }
  0xa0   : > { %v1086_v39 = vpop.permute.xlu0 %1085  ;;  %v1256_v40 = vpop.permute.xlu1 %1255  ;;  %3624 = vmatprep.mubr.msk.f32.mxu1 %vm3754_vm0, %v3753_v0 }
  0xa1   : > { %v1094_v42 = vsel %vm1091_vm7, %v1090_v37, %v1086_v39  ;;  %v1093_v50 = vsel %vm1091_vm7, %v1086_v39, %v1088_v36  ;;  %v3452_v39 = vld [vmem:[%s4313_s5 + $0x1] ss:$2 sm:$0x7] }
  0xa2   : > { %3623 = vmatpush3.msk.msra.mxu1 %vm290_vm2, %v1094_v42  ;;  %vm1766_vm11 = vcmp.eq.s32.totalorder %v3452_v39, 0 }
  0xa3   : > { %3625 = vmatmul.mubr.msk.f32.vlgmr.msra.gmra.mrb[10].mxu1 %vm286_vm3, %v3482_v41  ;;  %3627 = vmatprep.subr.mxu1 %v3753_v0 }
  0xa4   : > { %3473 = vmatmul.mubr.msk.f32.vlgmr.msra.gmra.mrb[0].mxu0 %vm286_vm3, %v3470_v35  ;;  %v1254_v44 = vpop.permute.xlu1 %1253  ;;  %v1258_v45 = vpop.permute.xlu0 %1257  ;;  %3629 = vmatprep.mubr.msk.f32.mxu1 %vm3754_vm0, %v3753_v0 }
  0xa5   : > { %3478 = vmatpush1.msk.msra.mxu0 %vm290_vm2, %v3825_v2  ;;  %1005 = vmatprep.mubr.f32.mxu0 %v3753_v0  ;;  %v1262_v47 = vsel %vm1259_vm8, %v1258_v45, %v1254_v44  ;;  %v1260_v51 = vsel %vm1259_vm8, %v1256_v40, %v1258_v45  ;;  %v1261_v59 = vsel %vm1259_vm8, %v1254_v44, %v1256_v40  ;;  %v1779_v40 = vshrl.u32 %v267_v6, 7 }
  0xa6   : > { %3483 = vmatprep.subr.msk.mxu0 %vm290_vm2, %v1092_v43  ;;  %3628 = vmatpush3.msk.msra.mxu1 %vm290_vm2, %v1262_v47  ;;  %v1777_v43 = vsel %vm1766_vm11, 1, %v3763_v5  ;;  %vm1796_vm11 = vcmp.eq.s32.totalorder %v3452_v39, 17 }
  0xa7   : > { %3630 = vmatmul.mubr.msk.f32.vlgmr.msra.gmra.mrb[12].mxu1 %vm286_vm3, %v3488_v46  ;;  %3632 = vmatprep.subr.mxu1 %v3753_v0  ;;  %v4059_v42 = vsub.s32 1, %v1779_v40 }
  0xa8   : > { %v1426_v48 = vpop.permute.xlu1 %1425  ;;  %v1424_v49 = vpop.permute.xlu0 %1423  ;;  %3634 = vmatprep.mubr.msk.f32.mxu1 %vm3754_vm0, %v3753_v0 }
  0xa9   : > { %v1428_v60 = vsel %vm4316_vm9, %v1424_v49, %v1426_v48  ;;  %v1785_v45 = vrot.slane %v1777_v43, %v4059_v42 }
  0xab   : > { %vm1791_vm13 = vcmp.eq.s32.totalorder %v1785_v45, 1 }
  0xac   : > { %3479 = vmatmul.mubr.msk.f32.vlgmr.msra.gmra.mrb[0].mxu0 %vm286_vm3, %v3476_v38  ;;  %v1590_v52 = vpop.permute.xlu1 %1589  ;;  %v1422_v53 = vpop.permute.xlu0 %1421 }
  0xad   : > { %3484 = vmatpush1.msk.msra.mxu0 %vm290_vm2, %v1093_v50  ;;  %1173 = vmatprep.mubr.f32.mxu0 %v3753_v0  ;;  %v1430_v55 = vsel %vm4316_vm9, %v1426_v48, %v1422_v53  ;;  %v1429_v62 = vsel %vm4316_vm9, %v1422_v53, %v1424_v49 }
  0xae   : > { %3489 = vmatprep.subr.msk.mxu0 %vm290_vm2, %v1260_v51  ;;  %3633 = vmatpush3.msk.msra.mxu1 %vm290_vm2, %v1430_v55 }
  0xaf   : > { %3635 = vmatmul.mubr.msk.f32.vlgmr.msra.gmra.mrb[14].mxu1 %vm286_vm3, %v3494_v54  ;;  %3637 = vmatprep.subr.mxu1 %v3753_v0 }
  0xb0   : > { %v1594_v56 = vpop.permute.xlu1 %1593  ;;  %3639 = vmatprep.mubr.msk.f32.mxu1 %vm3754_vm0, %v3753_v0  ;;  %v1592_v61 = vpop.permute.xlu0 %1591 }
  0xb1   : > { %v1598_v58 = vsel %vm4315_vm10, %v1594_v56, %v1590_v52  ;;  %v1596_v63 = vsel %vm4315_vm10, %v1592_v61, %v1594_v56  ;;  %v1597_v3 = vsel %vm4315_vm10, %v1590_v52, %v1592_v61  ;;  %v1807_v56 = vsel %vm1796_vm11, 1, %v3763_v5 }
  0xb2   : > { %3638 = vmatpush3.msk.msra.mxu1 %vm290_vm2, %v1598_v58  ;;  %vm1803_vm10 = vcmp.lt.s32.totalorder %v3884_v7, 2 }
  0xb3   : > { %3640 = vmatmul.mubr.msk.f32.vlgmr.msra.gmra.mrb[16].mxu1 %vm286_vm3, %v3500_v57  ;;  %3642 = vmatprep.subr.mxu1 %v3753_v0 }
  0xb4   : > { %3485 = vmatmul.mubr.msk.f32.vlgmr.msra.gmra.mrb[0].mxu0 %vm286_vm3, %v3482_v41  ;;  %3644 = vmatprep.mubr.msk.f32.mxu1 %vm3754_vm0, %v3753_v0  ;;  %v4057_v41 = vsub.s32 0, %v1779_v40 }
  0xb5   : > { %3490 = vmatpush1.msk.msra.mxu0 %vm290_vm2, %v1261_v59  ;;  %1341 = vmatprep.mubr.f32.mxu0 %v3753_v0 }
  0xb6   : > { %3495 = vmatprep.subr.msk.mxu0 %vm290_vm2, %v1428_v60  ;;  %v1781_v44 = vrot.slane %v1777_v43, %v4057_v41  ;;  %v1811_v58 = vrot.slane %v1807_v56, %v4057_v41 }
  0xb8   : > { %vm1790_vm12 = vcmp.eq.s32.totalorder %v1781_v44, 1 }
  0xbc   : > { %3491 = vmatmul.mubr.msk.f32.vlgmr.msra.gmra.mrb[0].mxu0 %vm286_vm3, %v3488_v46  ;;  %v4064_v46 = vsub.s32 2, %v1779_v40 }
  0xbd   : > { %3496 = vmatpush1.msk.msra.mxu0 %vm290_vm2, %v1429_v62  ;;  %1509 = vmatprep.mubr.f32.mxu0 %v3753_v0 }
  0xbe   : > { %3501 = vmatprep.subr.msk.mxu0 %vm290_vm2, %v1596_v63  ;;  %v1789_v48 = vrot.slane %v1777_v43, %v4064_v46  ;;  %v1819_v63 = vrot.slane %v1807_v56, %v4064_v46  ;;  %v3506_v43 = vld [vmem:[%s4311_s3 + $0x4] sm:$0xf] }
  0xc0   : > { %vm1792_vm15 = vcmp.eq.s32.totalorder %v1789_v48, 1 }
  0xc1   : > { %v1761_v31 = vpop.permute.xlu0 %1760 }
  0xc4   : > { %3497 = vmatmul.mubr.msk.f32.vlgmr.msra.gmra.mrb[0].mxu0 %vm286_vm3, %v3494_v54 }
  0xc5   : > { %3502 = vmatpush1.msk.msra.mxu0 %vm290_vm2, %v1597_v3  ;;  %1677 = vmatprep.mubr.f32.mxu0 %v3753_v0 }
  0xcc   : > { %3503 = vmatmul.mubr.msk.f32.vlgmr.msra.gmra.mrb[0].mxu0 %vm286_vm3, %v3500_v57  ;;  %v1815_v57 = vrot.slane %v1807_v56, %v4059_v42  ;;  %v3517_v56 = vld [vmem:[%s4311_s3 + $0x8] sm:$0xf] }
  0xcd   : > { %1983 = vmatprep.mubr.f32.mxu0 %v3753_v0 }
  0xce   : > { %vm1821_vm9 = vcmp.eq.s32.totalorder %v1815_v57, 1 }
 0x15f   : > { %v437_v4 = vpop.f32.mrb[0].mxu1 }
 0x160   : > { %v3601_v8 = vpop.f32.mrb[1].mxu1 }
 0x163   : > { %v590_v9 = vpop.f32.mrb[2].mxu1 }
 0x164   : > { %v591_v10 = vadd.f32 %v590_v9, %v437_v4  ;;  %v3606_v11 = vpop.f32.mrb[3].mxu1 }
 0x165   : > { %v254_v11 = vld [vmem:[%s4313_s5] ss:$2 sm:$0x7] }
 0x16a   : > { %v755_v12 = vpop.f32.mrb[4].mxu1 }
 0x16b   : > { %v761_v13 = vadd.f32 %v755_v12, %v591_v10  ;;  %v3611_v14 = vpop.f32.mrb[5].mxu1 }
 0x16e   : > { %v923_v15 = vpop.f32.mrb[6].mxu1 }
 0x16f   : > { %v929_v16 = vadd.f32 %v923_v15, %v761_v13  ;;  %v3616_v17 = vpop.f32.mrb[7].mxu1 }
 0x172   : > { %v1078_v18 = vpop.f32.mrb[8].mxu1 }
 0x173   : > { %v1084_v19 = vadd.f32 %v1078_v18, %v929_v16  ;;  %v3621_v20 = vpop.f32.mrb[9].mxu1 }
 0x176   : > { %v1246_v21 = vpop.f32.mrb[10].mxu1 }
 0x177   : > { %v1252_v22 = vadd.f32 %v1246_v21, %v1084_v19  ;;  %v3626_v23 = vpop.f32.mrb[11].mxu1 }
 0x17a   : > { %v1414_v24 = vpop.f32.mrb[12].mxu1 }
 0x17b   : > { %v1420_v25 = vadd.f32 %v1414_v24, %v1252_v22  ;;  %v3631_v26 = vpop.f32.mrb[13].mxu1 }
 0x182   : > { %v1582_v27 = vpop.f32.mrb[14].mxu1 }
 0x183   : > { %v1588_v28 = vadd.f32 %v1582_v27, %v1420_v25  ;;  %v3636_v29 = vpop.f32.mrb[15].mxu1 }
 0x186   : > { %v1750_v30 = vpop.f32.mrb[16].mxu1 }
 0x187   : > { %v1756_v32 = vadd.f32 %v1750_v30, %v1588_v28  ;;  %v3641_v33 = vpop.f32.mrb[17].mxu1 }
 0x189   : > { %v1765_v34 = vadd.f32 %v1761_v31, %v1756_v32 }
 0x18b   : > { %1771 = vrot.lane.b32.xlu0 %v1765_v34, %s3764_s18 }
 0x19f   : > { %v1679_v35 = vpop.f32.mrb[0].mxu0 }
 0x1a0   : > { %v1763_v36 = vadd.f32 %v1761_v31, %v1679_v35  ;;  %v1681_v37 = vpop.f32.mrb[1].mxu0 }
 0x1a1   : > { %v1764_v38 = vadd.f32 %v1761_v31, %v1681_v37  ;;  %v3373_v37 = vld [vmem:[%s4312_s4] sm:$0xf] }
 0x1a2   : > { %1767 = vrot.lane.b32.xlu1 %v1763_v36, %s3764_s18 }
 0x1a6   : > { %1769 = vrot.lane.b32.xlu1 %v1764_v38, %s3764_s18 }
 0x1fd   : > { %v1772_v49 = vpop.permute.xlu0 %1771 }
 0x214   : > { %v1768_v47 = vpop.permute.xlu1 %1767 }
 0x215   : > { %v1776_v54 = vsel %vm1773_vm14, %v1772_v49, %v1768_v47 }
 0x216   : > { %v1795_v55 = vsel %vm1792_vm15, %v1776_v54, %v1765_v34 }
 0x218   : > { %v1770_v6 = vpop.permute.xlu1 %1769 }
 0x219   : > { %v1774_v50 = vsel %vm1773_vm14, %v1770_v6, %v1772_v49  ;;  %v1775_v51 = vsel %vm1773_vm14, %v1768_v47, %v1770_v6  ;;  %vm1826_vm14 = vcmp.eq.s32.totalorder %v254_v11, 0 }
 0x21a   : > { %v1793_v52 = vsel %vm1790_vm12, %v1775_v51, %v1763_v36  ;;  %v1794_v53 = vsel %vm1791_vm13, %v1774_v50, %v1764_v38  ;;  %vm1820_vm12 = vcmp.eq.s32.totalorder %v1811_v58, 1  ;;  %vm1822_vm13 = vcmp.eq.s32.totalorder %v1819_v63, 1  ;;  %v1895_v50 = vld [vmem:[%s4311_s3] sm:$0xf] }
 0x21b   : > { %1797 = vrot.lane.b32.xlu1 %v1793_v52, %s3765_s24  ;;  %1799 = vrot.lane.b32.xlu0 %v1794_v53, %s3765_s24  ;;  %v1837_v12 = vsel %vm1826_vm14, 1, %v3763_v5 }
 0x21c   : > { %v1841_v13 = vrot.slane %v1837_v12, %v4057_v41  ;;  %v1849_v14 = vrot.slane %v1837_v12, %v4064_v46  ;;  %v1845_v15 = vrot.slane %v1837_v12, %v4059_v42 }
 0x21e   : > { %vm1850_vm15 = vcmp.eq.s32.totalorder %v1841_v13, 1  ;;  %vm1851_vm11 = vcmp.eq.s32.totalorder %v1845_v15, 1  ;;  %v3535_v13 = vld [vmem:[%s4311_s3 + $0x14] sm:$0xf] }
 0x21f   : > { %1801 = vrot.lane.b32.xlu1 %v1795_v55, %s3765_s24 }
 0x28d   : > { %v1798_v59 = vpop.permute.xlu1 %1797  ;;  %v1800_v60 = vpop.permute.xlu0 %1799 }
 0x28e   : > { %v1805_v61 = vsel %vm1803_vm10, %v1798_v59, %v1800_v60 }
 0x28f   : > { %v1824_v62 = vsel %vm1821_vm9, %v1805_v61, %v1794_v53  ;;  %vm1833_vm9 = vcmp.lt.s32.totalorder %v3884_v7, 92 }
 0x290   : > { %1829 = vrot.lane.b32.xlu1 %v1824_v62, %s3766_s25 }
 0x291   : > { %v1802_v3 = vpop.permute.xlu1 %1801 }
 0x292   : > { %v1806_v4 = vsel %vm1803_vm10, %v1802_v3, %v1798_v59  ;;  %v1804_v9 = vsel %vm1803_vm10, %v1800_v60, %v1802_v3  ;;  %vm1852_vm10 = vcmp.eq.s32.totalorder %v1849_v14, 1  ;;  %v3523_v3 = vld [vmem:[%s4311_s3 + $0xc] sm:$0xf] }
 0x293   : > { %v1823_v8 = vsel %vm1820_vm12, %v1806_v4, %v1793_v52  ;;  %v1825_v10 = vsel %vm1822_vm13, %v1804_v9, %v1795_v55  ;;  %vm1856_vm12 = vcmp.eq.s32.totalorder %v254_v11, 17  ;;  %vm1863_vm13 = vcmp.lt.s32.totalorder %v3884_v7, 36  ;;  %v3529_v9 = vld [vmem:[%s4311_s3 + $0x10] sm:$0xf] }
 0x294   : > { %1827 = vrot.lane.b32.xlu0 %v1823_v8, %s3766_s25  ;;  %v1867_v25 = vsel %vm1856_vm12, 1, %v3763_v5 }
 0x295   : > { %v1871_v26 = vrot.slane %v1867_v25, %v4057_v41  ;;  %v1875_v27 = vrot.slane %v1867_v25, %v4059_v42  ;;  %v1879_v29 = vrot.slane %v1867_v25, %v4064_v46  ;;  %v3547_v25 = vld [vmem:[%s4311_s3 + $0x1c] sm:$0xf] }
 0x297   : > { %vm1880_vm14 = vcmp.eq.s32.totalorder %v1871_v26, 1 }
 0x298   : > { %1831 = vrot.lane.b32.xlu0 %v1825_v10, %s3766_s25 }
 0x302   : > { %v1830_v16 = vpop.permute.xlu1 %1829 }
 0x306   : > { %v1828_v17 = vpop.permute.xlu0 %1827 }
 0x307   : > { %v1835_v18 = vsel %vm1833_vm9, %v1828_v17, %v1830_v16 }
 0x308   : > { %v1853_v19 = vsel %vm1850_vm15, %v1835_v18, %v1823_v8  ;;  %vm1881_vm15 = vcmp.eq.s32.totalorder %v1875_v27, 1  ;;  %v3541_v18 = vld [vmem:[%s4311_s3 + $0x18] sm:$0xf] }
 0x309   : > { %1857 = vrot.lane.b32.xlu1 %v1853_v19, %s3767_s12 }
 0x30a   : > { %v1832_v20 = vpop.permute.xlu0 %1831 }
 0x30b   : > { %v1834_v21 = vsel %vm1833_vm9, %v1830_v16, %v1832_v20  ;;  %v1836_v22 = vsel %vm1833_vm9, %v1832_v20, %v1828_v17  ;;  %vm1882_vm9 = vcmp.eq.s32.totalorder %v1879_v29, 1  ;;  %v3553_v29 = vld [vmem:[%s4311_s3 + $0x20] sm:$0xf] }
 0x30c   : > { %v1855_v23 = vsel %vm1852_vm10, %v1836_v22, %v1825_v10  ;;  %v1854_v24 = vsel %vm1851_vm11, %v1834_v21, %v1824_v62 }
 0x30d   : > { %1861 = vrot.lane.b32.xlu1 %v1855_v23, %s3767_s12  ;;  %1859 = vrot.lane.b32.xlu0 %v1854_v24, %s3767_s12 }
 0x37b   : > { %v1858_v28 = vpop.permute.xlu1 %1857 }
 0x37f   : > { %v1862_v30 = vpop.permute.xlu1 %1861  ;;  %v1860_v31 = vpop.permute.xlu0 %1859 }
 0x380   : > { %v1866_v32 = vsel %vm1863_vm13, %v1862_v30, %v1858_v28  ;;  %v1865_v33 = vsel %vm1863_vm13, %v1858_v28, %v1860_v31  ;;  %v1864_v5 = vsel %vm1863_vm13, %v1860_v31, %v1862_v30 }
 0x381   : > { %v4086_v34 = vsel %vm1880_vm14, %v1866_v32, %v1853_v19  ;;  %v4088_v35 = vsel %vm1881_vm15, %v1865_v33, %v1854_v24  ;;  %v4094_v36 = vsel %vm1882_vm9, %v1864_v5, %v1855_v23 }
 0x382   : > { %1896 = vrot.lane.b32.xlu0 %v4086_v34, %s3755_s27  ;;  %1898 = vrot.lane.b32.xlu1 %v4088_v35, %s3755_s27 }
 0x386   : > { %1886 = vrot.lane.b32.xlu1 %v4086_v34, %s3756_s28  ;;  %1900 = vrot.lane.b32.xlu0 %v4094_v36, %s3755_s27 }
 0x38a   : > { %1890 = vrot.lane.b32.xlu1 %v4094_v36, %s3756_s28  ;;  %1888 = vrot.lane.b32.xlu0 %v4088_v35, %s3756_s28  ;;  %s251_s28 = scalar_lea.vmem %s4314_s6, %s3719_s23 }
 0x38e   : > { %2215 = vrot.lane.b32.xlu1 %v4088_v35, %s3757_s29  ;;  %2213 = vrot.lane.b32.xlu0 %v4086_v34, %s3757_s29 }
 0x392   : > { %2380 = vrot.lane.b32.xlu1 %v4086_v34, %s3758_s30  ;;  %2217 = vrot.lane.b32.xlu0 %v4094_v36, %s3757_s29 }
 0x396   : > { %2384 = vrot.lane.b32.xlu1 %v4094_v36, %s3758_s30  ;;  %2382 = vrot.lane.b32.xlu0 %v4088_v35, %s3758_s30 }
 0x39a   : > { %2709 = vrot.lane.b32.xlu1 %v4094_v36, %s3759_s7  ;;  %2707 = vrot.lane.b32.xlu0 %v4088_v35, %s3759_s7 }
 0x39e   : > { %2874 = vrot.lane.b32.xlu1 %v4088_v35, %s3760_s8  ;;  %2705 = vrot.lane.b32.xlu0 %v4086_v34, %s3759_s7 }
 0x3a2   : > { %2872 = vrot.lane.b32.xlu1 %v4086_v34, %s3760_s8  ;;  %2876 = vrot.lane.b32.xlu0 %v4094_v36, %s3760_s8 }
 0x3a6   : > { %3043 = vrot.lane.b32.xlu1 %v4094_v36, %s3761_s9  ;;  %3041 = vrot.lane.b32.xlu0 %v4088_v35, %s3761_s9 }
 0x3aa   : > { %3208 = vrot.lane.b32.xlu1 %v4088_v35, %s3762_s10  ;;  %3039 = vrot.lane.b32.xlu0 %v4086_v34, %s3761_s9 }
 0x3ae   : > { %3206 = vrot.lane.b32.xlu1 %v4086_v34, %s3762_s10  ;;  %3210 = vrot.lane.b32.xlu0 %v4094_v36, %s3762_s10 }
 0x3b2   : > { %3376 = vperm.xlu0 %3743, %v3373_v37  }
 0x3f4   : > { %v1899_v38 = vpop.permute.xlu1 %1898  ;;  %v1897_v39 = vpop.permute.xlu0 %1896 }
 0x3f5   : > { %v1903_v40 = vsel %vm280_vm1, %v1897_v39, %v1899_v38 }
 0x3f6   : > { %3507 = vmatprep.subr.msk.mxu0 %vm290_vm2, %v1903_v40 }
 0x3f8   : > { %v1887_v41 = vpop.permute.xlu1 %1886  ;;  %v1901_v42 = vpop.permute.xlu0 %1900 }
 0x3f9   : > { %v1902_v44 = vsel %vm280_vm1, %v1899_v38, %v1901_v42  ;;  %v1904_v45 = vsel %vm280_vm1, %v1901_v42, %v1897_v39  ;;  %vm4317_vm1 = vcmp.lt.s32.totalorder %v3884_v7, 110 }
 0x3fa   : > { %3508 = vmatpush1.msk.msra.mxu0 %vm290_vm2, %v1904_v45  ;;  %3643 = vmatpush3.msk.msra.mxu1 %vm290_vm2, %v1902_v44 }
 0x3fb   : > { %3509 = vmatmul.mubr.msk.f32.vlgmr.msra.gmra.mrb[2].mxu0 %vm286_vm3, %v3506_v43  ;;  %3647 = vmatprep.subr.mxu1 %v3753_v0 }
 0x3fc   : > { %v1891_v46 = vpop.permute.xlu1 %1890  ;;  %v1889_v47 = vpop.permute.xlu0 %1888  ;;  %3645 = vmatmul.mubr.msk.f32.vlgmr.msra.gmra.mrb[18].mxu1 %vm286_vm3, %v3506_v43  ;;  %2136 = vmatprep.mubr.f32.mxu0 %v3753_v0 }
 0x3fd   : > { %v1894_v48 = vsel %vm269_vm4, %v1891_v46, %v1887_v41  ;;  %v1892_v49 = vsel %vm269_vm4, %v1889_v47, %v1891_v46  ;;  %v1893_v6 = vsel %vm269_vm4, %v1887_v41, %v1889_v47  ;;  %3649 = vmatprep.mubr.msk.f32.mxu1 %vm3754_vm0, %v3753_v0  ;;  %vm4318_vm4 = vcmp.lt.s32.totalorder %v3884_v7, 109 }
 0x3fe   : > { %3512 = vmatprep.subr.msk.mxu0 %vm290_vm2, %v1893_v6  ;;  %3648 = vmatpush3.msk.msra.mxu1 %vm290_vm2, %v1892_v49 }
 0x3ff   : > { %3513 = vmatpush1.msk.msra.mxu0 %vm290_vm2, %v1894_v48  ;;  %3652 = vmatprep.subr.mxu1 %v3753_v0 }
 0x400   : > { %v2216_v51 = vpop.permute.xlu1 %2215  ;;  %v2214_v52 = vpop.permute.xlu0 %2213  ;;  %3650 = vmatmul.mubr.msk.f32.vlgmr.msra.gmra.mrb[20].mxu1 %vm286_vm3, %v1895_v50 }
 0x401   : > { %v2220_v53 = vsel %vm600_vm5, %v2214_v52, %v2216_v51  ;;  %3654 = vmatprep.mubr.msk.f32.mxu1 %vm3754_vm0, %v3753_v0 }
 0x402   : > { %3518 = vmatprep.subr.msk.mxu0 %vm290_vm2, %v2220_v53 }
 0x403   : > { %3514 = vmatmul.mubr.msk.f32.vlgmr.msra.gmra.mrb[2].mxu0 %vm286_vm3, %v1895_v50 }
 0x404   : > { %v2381_v54 = vpop.permute.xlu1 %2380  ;;  %v2218_v55 = vpop.permute.xlu0 %2217  ;;  %2300 = vmatprep.mubr.f32.mxu0 %v3753_v0 }
 0x405   : > { %v2219_v57 = vsel %vm600_vm5, %v2216_v51, %v2218_v55  ;;  %v2221_v58 = vsel %vm600_vm5, %v2218_v55, %v2214_v52  ;;  %vm4319_vm5 = vmmov %vm4317_vm1 }
 0x406   : > { %3519 = vmatpush1.msk.msra.mxu0 %vm290_vm2, %v2221_v58  ;;  %3653 = vmatpush3.msk.msra.mxu1 %vm290_vm2, %v2219_v57 }
 0x407   : > { %3655 = vmatmul.mubr.msk.f32.vlgmr.msra.gmra.mrb[22].mxu1 %vm286_vm3, %v3517_v56  ;;  %3657 = vmatprep.subr.mxu1 %v3753_v0 }
 0x408   : > { %v2385_v59 = vpop.permute.xlu1 %2384  ;;  %v2383_v60 = vpop.permute.xlu0 %2382  ;;  %3659 = vmatprep.mubr.msk.f32.mxu1 %vm3754_vm0, %v3753_v0 }
 0x409   : > { %v2388_v61 = vsel %vm768_vm6, %v2385_v59, %v2381_v54  ;;  %v2386_v62 = vsel %vm768_vm6, %v2383_v60, %v2385_v59  ;;  %v2387_v63 = vsel %vm768_vm6, %v2381_v54, %v2383_v60  ;;  %vm4321_vm6 = vmmov %vm4318_vm4 }
 0x40a   : > { %3524 = vmatprep.subr.msk.mxu0 %vm290_vm2, %v2387_v63  ;;  %3658 = vmatpush3.msk.msra.mxu1 %vm290_vm2, %v2386_v62 }
 0x40b   : > { %3520 = vmatmul.mubr.msk.f32.vlgmr.msra.gmra.mrb[2].mxu0 %vm286_vm3, %v3517_v56  ;;  %3662 = vmatprep.subr.mxu1 %v3753_v0 }
 0x40c   : > { %3525 = vmatpush1.msk.msra.mxu0 %vm290_vm2, %v2388_v61  ;;  %v2710_v4 = vpop.permute.xlu1 %2709  ;;  %3660 = vmatmul.mubr.msk.f32.vlgmr.msra.gmra.mrb[24].mxu1 %vm286_vm3, %v3523_v3  ;;  %v2708_v8 = vpop.permute.xlu0 %2707 }
 0x40d   : > { %3530 = vmatprep.subr.msk.mxu0 %vm290_vm2, %v4088_v35  ;;  %3663 = vmatpush3.msk.msra.mxu1 %vm290_vm2, %v4094_v36  ;;  %v2711_v14 = vsel %vm1091_vm7, %v2708_v8, %v2710_v4 }
 0x40e   : > { %3664 = vmatprep.mubr.msk.f32.mxu1 %vm3754_vm0, %v3753_v0  ;;  %3667 = vmatprep.subr.mxu1 %v3753_v0 }
 0x40f   : > { %2467 = vmatprep.mubr.f32.mxu0 %v3753_v0 }
 0x410   : > { %v2875_v10 = vpop.permute.xlu1 %2874  ;;  %v2706_v11 = vpop.permute.xlu0 %2705  ;;  %3665 = vmatmul.mubr.msk.f32.vlgmr.msra.gmra.mrb[26].mxu1 %vm286_vm3, %v3529_v9 }
 0x411   : > { %v2713_v12 = vsel %vm1091_vm7, %v2710_v4, %v2706_v11  ;;  %3669 = vmatprep.mubr.msk.f32.mxu1 %vm3754_vm0, %v3753_v0  ;;  %v2712_v21 = vsel %vm1091_vm7, %v2706_v11, %v2708_v8  ;;  %vm4322_vm7 = vmmov %vm4318_vm4 }
 0x412   : > { %3668 = vmatpush3.msk.msra.mxu1 %vm290_vm2, %v2713_v12 }
 0x413   : > { %3526 = vmatmul.mubr.msk.f32.vlgmr.msra.gmra.mrb[2].mxu0 %vm286_vm3, %v3523_v3  ;;  %3672 = vmatprep.subr.mxu1 %v3753_v0 }
 0x414   : > { %3531 = vmatpush1.msk.msra.mxu0 %vm290_vm2, %v4086_v34  ;;  %v2873_v15 = vpop.permute.xlu1 %2872  ;;  %v2877_v16 = vpop.permute.xlu0 %2876  ;;  %3670 = vmatmul.mubr.msk.f32.vlgmr.msra.gmra.mrb[28].mxu1 %vm286_vm3, %v3535_v13 }
 0x415   : > { %3536 = vmatprep.subr.msk.mxu0 %vm290_vm2, %v2711_v14  ;;  %v2880_v17 = vsel %vm1259_vm8, %v2877_v16, %v2873_v15  ;;  %2625 = vmatprep.mubr.f32.mxu0 %v3753_v0  ;;  %v2878_v22 = vsel %vm1259_vm8, %v2875_v10, %v2877_v16  ;;  %v2879_v31 = vsel %vm1259_vm8, %v2873_v15, %v2875_v10 }
 0x416   : > { %3673 = vmatpush3.msk.msra.mxu1 %vm290_vm2, %v2880_v17  ;;  %3674 = vmatprep.mubr.msk.f32.mxu1 %vm3754_vm0, %v3753_v0 }
 0x417   : > { %3677 = vmatprep.subr.mxu1 %v3753_v0 }
 0x418   : > { %v3044_v19 = vpop.permute.xlu1 %3043  ;;  %v3042_v20 = vpop.permute.xlu0 %3041  ;;  %3675 = vmatmul.mubr.msk.f32.vlgmr.msra.gmra.mrb[30].mxu1 %vm286_vm3, %v3541_v18 }
 0x419   : > { %3679 = vmatprep.mubr.msk.f32.mxu1 %vm3754_vm0, %v3753_v0  ;;  %v3045_v32 = vsel %vm4319_vm5, %v3042_v20, %v3044_v19 }
 0x41b   : > { %3532 = vmatmul.mubr.msk.f32.vlgmr.msra.gmra.mrb[2].mxu0 %vm286_vm3, %v3529_v9 }
 0x41c   : > { %3537 = vmatpush1.msk.msra.mxu0 %vm290_vm2, %v2712_v21  ;;  %v3209_v23 = vpop.permute.xlu1 %3208  ;;  %v3040_v24 = vpop.permute.xlu0 %3039  ;;  %2792 = vmatprep.mubr.f32.mxu0 %v3753_v0 }
 0x41d   : > { %3542 = vmatprep.subr.msk.mxu0 %vm290_vm2, %v2878_v22  ;;  %v3047_v26 = vsel %vm4317_vm1, %v3044_v19, %v3040_v24 }
 0x41e   : > { %3678 = vmatpush3.msk.msra.mxu1 %vm290_vm2, %v3047_v26 }
 0x41f   : > { %3680 = vmatmul.mubr.msk.f32.vlgmr.msra.gmra.mrb[32].mxu1 %vm286_vm3, %v3547_v25  ;;  %3682 = vmatprep.subr.mxu1 %v3753_v0 }
 0x420   : > { %v3207_v27 = vpop.permute.xlu1 %3206  ;;  %v3211_v28 = vpop.permute.xlu0 %3210  ;;  %3684 = vmatprep.mubr.msk.f32.mxu1 %vm3754_vm0, %v3753_v0  ;;  %vm4320_vm0 = vmmov %vm4317_vm1 }
 0x421   : > { %v3214_v30 = vsel %vm4318_vm4, %v3211_v28, %v3207_v27  ;;  %v3046_v33 = vsel %vm4320_vm0, %v3040_v24, %v3042_v20  ;;  %v3212_v34 = vsel %vm4321_vm6, %v3209_v23, %v3211_v28  ;;  %v3213_v35 = vsel %vm4322_vm7, %v3207_v27, %v3209_v23 }
 0x422   : > { %3683 = vmatpush3.msk.msra.mxu1 %vm290_vm2, %v3214_v30 }
 0x423   : > { %3538 = vmatmul.mubr.msk.f32.vlgmr.msra.gmra.mrb[2].mxu0 %vm286_vm3, %v3535_v13  ;;  %3685 = vmatmul.mubr.msk.f32.vlgmr.msra.gmra.mrb[34].mxu1 %vm286_vm3, %v3553_v29 }
 0x424   : > { %3543 = vmatpush1.msk.msra.mxu0 %vm290_vm2, %v2879_v31  ;;  %2959 = vmatprep.mubr.f32.mxu0 %v3753_v0 }
 0x425   : > { %3548 = vmatprep.subr.msk.mxu0 %vm290_vm2, %v3045_v32 }
 0x42b   : > { %3544 = vmatmul.mubr.msk.f32.vlgmr.msra.gmra.mrb[2].mxu0 %vm286_vm3, %v3541_v18 }
 0x42c   : > { %3549 = vmatpush1.msk.msra.mxu0 %vm290_vm2, %v3046_v33  ;;  %3126 = vmatprep.mubr.f32.mxu0 %v3753_v0 }
 0x42d   : > { %3554 = vmatprep.subr.msk.mxu0 %vm290_vm2, %v3212_v34 }
 0x431   : > { %v3377_v58 = vpop.permute.xlu0 %3376 }
 0x433   : > { %3550 = vmatmul.mubr.msk.f32.vlgmr.msra.gmra.mrb[2].mxu0 %vm286_vm3, %v3547_v25 }
 0x434   : > { %3555 = vmatpush1.msk.msra.mxu0 %vm290_vm2, %v3213_v35  ;;  %3293 = vmatprep.mubr.f32.mxu0 %v3753_v0 }
 0x43b   : > { %3556 = vmatmul.mubr.msk.f32.vlgmr.msra.gmra.mrb[2].mxu0 %vm286_vm3, %v3553_v29 }
 0x4cf   : > { %v2056_v5 = vpop.f32.mrb[18].mxu1 }
 0x4d0   : > { %v3646_v36 = vpop.f32.mrb[19].mxu1 }
 0x4d3   : > { %v2209_v37 = vpop.f32.mrb[20].mxu1 }
 0x4d4   : > { %v2210_v38 = vadd.f32 %v2209_v37, %v2056_v5  ;;  %v3651_v39 = vpop.f32.mrb[21].mxu1 }
 0x4da   : > { %v2373_v40 = vpop.f32.mrb[22].mxu1 }
 0x4db   : > { %v2379_v41 = vadd.f32 %v2373_v40, %v2210_v38  ;;  %v3656_v42 = vpop.f32.mrb[23].mxu1 }
 0x4df   : > { %v2540_v43 = vpop.f32.mrb[24].mxu1 }
 0x4e0   : > { %v2546_v44 = vadd.f32 %v2540_v43, %v2379_v41  ;;  %v3661_v7 = vpop.f32.mrb[25].mxu1 }
 0x4e3   : > { %v2698_v45 = vpop.f32.mrb[26].mxu1 }
 0x4e4   : > { %v2704_v46 = vadd.f32 %v2698_v45, %v2546_v44  ;;  %v3666_v47 = vpop.f32.mrb[27].mxu1 }
 0x4e7   : > { %v2865_v48 = vpop.f32.mrb[28].mxu1 }
 0x4e8   : > { %v2871_v49 = vadd.f32 %v2865_v48, %v2704_v46  ;;  %v3671_v0 = vpop.f32.mrb[29].mxu1 }
 0x4eb   : > { %v3032_v6 = vpop.f32.mrb[30].mxu1 }
 0x4ec   : > { %v3038_v50 = vadd.f32 %v3032_v6, %v2871_v49  ;;  %v3676_v51 = vpop.f32.mrb[31].mxu1 }
 0x4f2   : > { %v3199_v52 = vpop.f32.mrb[32].mxu1 }
 0x4f3   : > { %v3205_v53 = vadd.f32 %v3199_v52, %v3038_v50  ;;  %v3681_v54 = vpop.f32.mrb[33].mxu1 }
 0x4f6   : > { %v3366_v55 = vpop.f32.mrb[34].mxu1 }
 0x4f7   : > { %v3372_v56 = vadd.f32 %v3366_v55, %v3205_v53  ;;  %v3686_v57 = vpop.f32.mrb[35].mxu1 }
 0x4f9   : > { %v3381_v59 = vadd.f32 %v3377_v58, %v3372_v56 }
 0x4fb   : > { %v3387_v60 = vadd.f32 %v3381_v59, %v3823_v1 }
 0x4fd   : > { %3389 = vst [vmem:[%s251_s28 + $0x8] sm:$0xf] %v3387_v60 }
 0x50e   : > { %v3295_v61 = vpop.f32.mrb[2].mxu0 }
 0x50f   : > { %v3379_v62 = vadd.f32 %v3377_v58, %v3295_v61  ;;  %v3297_v63 = vpop.f32.mrb[3].mxu0 }
 0x510   : > { %v3380_v3 = vadd.f32 %v3377_v58, %v3297_v63 }
 0x512   : > { %v3384_v4 = vcombine.low %v3379_v62, %v3380_v3 }
 0x514   : > { %v3386_v8 = vadd.f32 %v3384_v4, %v3825_v2 }
 0x516   : > { %3388 = vst [vmem:[%s251_s28] sm:$0xff] %v3386_v8 }
 0x517 PF: > { %s16_s21 = sadd.s32 1, %s3751_s21  }
 0x518   : > { %p13_p4 = scmp.ge.s32.totalorder %s16_s21, 4  }
 0x51a   :  { %15 = sbr.rel (!%p13_p4) target bundleno = 1 (0x1), region = 91 }

</bundles_post_ra>
